<compile_context>
chip_gen: v6e
topology: v6e:2x2x1
jax: 0.10.0
libtpu: 0.0.40
codegen_flags: <defaults>
</compile_context>

<pallas_src>
import functools
import math

import jax
import jax.numpy as jnp
from jax.experimental import pallas as pl
from jax.experimental.pallas import tpu as pltpu

LOG_STD_MAX = 2.0
LOG_STD_MIN = -20.0
EPS = 1e-8


def _round_up(x, m):
    return (x + m - 1) // m * m


def _cdiv(a, b):
    return -(-a // b)


def _choose_tiling(batch, batch_tile):
    """Balanced, lane-aligned batch tiles; even grid (>1) for v7x's 2 TCs."""
    n_tiles = max(1, _cdiv(batch, batch_tile))
    if n_tiles > 1 and n_tiles % 2:
        n_tiles += 1                      # even grid -> both v7x TensorCores busy
    if n_tiles == 1:
        tb = batch                        # block == full array dim, any size ok
    else:
        tb = _round_up(_cdiv(batch, n_tiles), 128)   # lane-aligned tiles
    return n_tiles, tb, n_tiles * tb


def _actor_kernel(act_dim, h2_dim, approx_reciprocal,
                  obs_ref, eps_ref, w1_ref, w2_ref, wh_ref, bias_ref,
                  out_ref):
    # Shapes (feature-major, batch on lanes):
    #   obs_ref : (obs_dim+1, tb)   last row == 1 (folds b1 into W1)
    #   eps_ref : (act_dim,   tb)   f32
    #   w1_ref  : (h1_dim, obs_dim+1)   (matmul dtype; last col == b1)
    #   w2_ref  : (h2_dim, h1_dim)
    #   wh_ref  : (2*act_dim, h2_dim)   rows = [Wmu ; Wlogstd]
    #   bias_ref: (h2_dim + 2*act_dim, 1) f32   rows = [b2 ; bmu ; bls]
    #   out_ref : (out_rows, tb)    rows = [pi | tanh(mu) | std | logp | pad]
    x = obs_ref[...]
    h1 = jnp.dot(w1_ref[...], x, preferred_element_type=jnp.float32)
    h1 = jnp.maximum(h1, 0.0)                                   # (h1, tb) f32

    b2 = bias_ref[0:h2_dim, :]                                  # (h2, 1)
    h2 = jnp.dot(w2_ref[...], h1.astype(w2_ref.dtype),
                 preferred_element_type=jnp.float32) + b2
    h2 = jnp.maximum(h2, 0.0)                                   # (h2, tb)

    bh = bias_ref[h2_dim:h2_dim + 2 * act_dim, :]               # (2*act, 1)
    heads = jnp.dot(wh_ref[...], h2.astype(wh_ref.dtype),
                    preferred_element_type=jnp.float32) + bh    # (2*act, tb)

    mu = heads[0:act_dim, :]                                    # sublane slices
    log_std = jnp.clip(heads[act_dim:2 * act_dim, :], LOG_STD_MIN, LOG_STD_MAX)
    std = jnp.exp(log_std)

    eps = eps_ref[...]
    e_s = eps * std                 # reused: pre = mu + e_s, numerator of z
    pre = mu + e_s
    tanh_pre = jnp.tanh(pre)
    tanh_mu = jnp.tanh(mu)

    denom = std + EPS
    if approx_reciprocal:
        inv = pl.reciprocal(denom, approx=True)   # EUP slot (has slack here)
    else:
        inv = 1.0 / denom                          # exact parity path
    z = e_s * inv                   # == (pre - mu) / (std + EPS)

    # log_likelihood with squash correction (squash == 1), as in the module.
    # TODO(synk): reference uses log(1 - tanh(pre)^2 + EPS), which saturates
    # for |pre| >~ 9; kept as-is for exact parity with the PyTorch forward.
    logli = -(jnp.sum(log_std + 0.5 * z * z, axis=0, keepdims=True)
              + 0.5 * act_dim * math.log(2.0 * math.pi))
    logli = logli - jnp.sum(jnp.log((1.0 - tanh_pre * tanh_pre) + EPS),
                            axis=0, keepdims=True)              # (1, tb)

    # Lane-dense writeback: every store covers all tb lanes.
    out_ref[0:act_dim, :] = tanh_pre
    out_ref[act_dim:2 * act_dim, :] = tanh_mu
    out_ref[2 * act_dim:3 * act_dim, :] = std
    out_ref[3 * act_dim:3 * act_dim + 1, :] = logli
    pad_rows = out_ref.shape[0] - (3 * act_dim + 1)
    if pad_rows > 0:
        out_ref[3 * act_dim + 1:, :] = jnp.zeros((pad_rows, out_ref.shape[1]),
                                                 jnp.float32)


def pack_actor_params(params, matmul_dtype=jnp.bfloat16):
    """Pack PyTorch-style params (w1,b1,w2,b2,wmu,bmu,wls,bls) — weights in
    (in, out) layout, biases (1, out) — into the kernel's feature-major form.
    Do this once, outside the training/acting loop.  bf16 by default for the
    MXU; pass jnp.float32 for strict f32 parity."""
    w1, b1, w2, b2, wmu, bmu, wls, bls = params
    w1_fm = jnp.concatenate([w1.T, b1.T], axis=1)             # (h1, obs+1), b1 folded
    w2_fm = w2.T                                              # (h2, h1)
    wh_fm = jnp.concatenate([wmu.T, wls.T], axis=0)           # (2*act, h2)
    bias_col = jnp.concatenate([b2.T, bmu.T, bls.T], axis=0)  # (h2+2*act, 1)
    return (w1_fm.astype(matmul_dtype), w2_fm.astype(matmul_dtype),
            wh_fm.astype(matmul_dtype), bias_col.astype(jnp.float32))


def squashed_gaussian_actor_forward(obs, epsilon, packed_params, act_dim,
                                    batch_tile=2048, approx_reciprocal=True):
    """Returns (pi_action, logp_pi, epsilon, tanh(mu), std) — same as the
    PyTorch forward with deterministic=False, with_logprob=True."""
    w1_fm, w2_fm, wh_fm, bias_col = packed_params
    h1_dim, obs_dim_p1 = w1_fm.shape
    obs_dim = obs_dim_p1 - 1
    h2_dim = w2_fm.shape[0]
    assert wh_fm.shape == (2 * act_dim, h2_dim)
    assert bias_col.shape == (h2_dim + 2 * act_dim, 1)
    out_rows = _round_up(3 * act_dim + 1, 8)

    B = obs.shape[0]
    n_tiles, tb, b_pad = _choose_tiling(B, batch_tile)

    # Feature-major inputs: batch on the lane axis; ones row folds b1 into W1.
    obs_t = jnp.concatenate([obs.T.astype(jnp.float32),
                             jnp.ones((1, B), jnp.float32)], axis=0)
    eps_t = epsilon.T.astype(jnp.float32)
    if b_pad != B:
        pad = b_pad - B
        obs_t = jnp.pad(obs_t, ((0, 0), (0, pad)))
        eps_t = jnp.pad(eps_t, ((0, 0), (0, pad)))
    obs_t = obs_t.astype(w1_fm.dtype)          # bf16 MXU inputs by default

    itm = w1_fm.dtype.itemsize
    cost = pl.CostEstimate(
        flops=2 * b_pad * (h1_dim * (obs_dim + 1) + h2_dim * h1_dim
                           + 2 * act_dim * h2_dim),
        transcendentals=b_pad * 5 * act_dim,          # exp + 2*tanh + log + rcp
        bytes_accessed=(obs_t.size * itm + eps_t.size * 4
                        + b_pad * out_rows * 4
                        + (w1_fm.size + w2_fm.size + wh_fm.size) * itm
                        + bias_col.size * 4),
    )

    kernel = functools.partial(_actor_kernel, act_dim, h2_dim, approx_reciprocal)

    out = pl.pallas_call(
        kernel,
        out_shape=jax.ShapeDtypeStruct((out_rows, b_pad), jnp.float32),
        grid_spec=pltpu.PrefetchScalarGridSpec(
            num_scalar_prefetch=0,
            grid=(n_tiles,),
            in_specs=[
                pl.BlockSpec((obs_dim + 1, tb), lambda i: (0, i)),        # obs'
                pl.BlockSpec((act_dim, tb), lambda i: (0, i)),            # eps'
                pl.BlockSpec((h1_dim, obs_dim + 1), lambda i: (0, 0)),    # W1'
                pl.BlockSpec((h2_dim, h1_dim), lambda i: (0, 0)),         # W2'
                pl.BlockSpec((2 * act_dim, h2_dim), lambda i: (0, 0)),    # Wh'
                pl.BlockSpec((h2_dim + 2 * act_dim, 1), lambda i: (0, 0)),  # biases
            ],
            out_specs=pl.BlockSpec((out_rows, tb), lambda i: (0, i)),
        ),
        compiler_params=pltpu.CompilerParams(
            dimension_semantics=("parallel",)),     # shards batch tiles on v7x
        cost_estimate=cost,
    )(obs_t, eps_t, w1_fm, w2_fm, wh_fm, bias_col)

    out_bt = out[:, :B].T                          # (B, out_rows)
    pi = out_bt[:, 0:act_dim]
    tanh_mu = out_bt[:, act_dim:2 * act_dim]
    std = out_bt[:, 2 * act_dim:3 * act_dim]
    logp = out_bt[:, 3 * act_dim]
    return pi, logp, epsilon, tanh_mu, std


def _reference_forward(obs, epsilon, params, act_dim):
    """Plain-JAX reference mirroring the PyTorch module."""
    w1, b1, w2, b2, wmu, bmu, wls, bls = params
    h1 = jnp.maximum(obs @ w1 + b1, 0.0)
    h2 = jnp.maximum(h1 @ w2 + b2, 0.0)
    mu = h2 @ wmu + bmu
    log_std = jnp.clip(h2 @ wls + bls, LOG_STD_MIN, LOG_STD_MAX)
    std = jnp.exp(log_std)
    pre = mu + epsilon * std
    z = (pre - mu) / (std + EPS)
    logli = -(jnp.sum(log_std + 0.5 * z * z, axis=-1)
              + 0.5 * act_dim * math.log(2.0 * math.pi))
    logli = logli - jnp.sum(jnp.log(1.0 - jnp.tanh(pre) ** 2 + EPS), axis=-1)
    return jnp.tanh(pre), logli, epsilon, jnp.tanh(mu), std


def _init_params(key, obs_dim, hidden_sizes, act_dim):
    """Deterministic PyTorch-Linear-style init (uniform(-1/sqrt(fan_in), +))."""
    sizes = [obs_dim] + list(hidden_sizes)
    params = []
    dims = list(zip(sizes[:-1], sizes[1:])) + [(hidden_sizes[-1], act_dim),
                                               (hidden_sizes[-1], act_dim)]
    for (fan_in, fan_out) in dims:
        key, kw, kb = jax.random.split(key, 3)
        bound = 1.0 / math.sqrt(fan_in)
        w = jax.random.uniform(kw, (fan_in, fan_out), jnp.float32, -bound, bound)
        b = jax.random.uniform(kb, (1, fan_out), jnp.float32, -bound, bound)
        params += [w, b]
    return tuple(params)


if __name__ == "__main__":
    B, OBS_DIM, ACT_DIM = 8, 16, 4
    HIDDEN = (32, 32)
    ACT_LIMIT = 1.0  # unused in this forward variant (tanh only, no scaling)

    key = jax.random.PRNGKey(0)
    k_obs, k_eps, k_par = jax.random.split(key, 3)
    obs = jax.random.normal(k_obs, (B, OBS_DIM), jnp.float32)
    epsilon = jax.random.normal(k_eps, (B, ACT_DIM), jnp.float32)
    params = _init_params(k_par, OBS_DIM, HIDDEN, ACT_DIM)

    # (1) Fast production path: bf16 MXU inputs + EUP approx reciprocal.
    packed_fast = pack_actor_params(params)                     # bf16 default
    fast_out = squashed_gaussian_actor_forward(obs, epsilon, packed_fast, ACT_DIM)
    jax.block_until_ready(fast_out)
    assert all(bool(jnp.all(jnp.isfinite(t))) for t in fast_out)

    # (2) Strict f32 parity path against the plain-JAX reference (bf16 would
    #     not meet these tolerances; approx reciprocal shifts logp slightly).
    packed_f32 = pack_actor_params(params, matmul_dtype=jnp.float32)
    pi, logp, eps_out, tanh_mu, std = squashed_gaussian_actor_forward(
        obs, epsilon, packed_f32, ACT_DIM, approx_reciprocal=False)
    jax.block_until_ready((pi, logp, eps_out, tanh_mu, std))

    pi_r, logp_r, _, tanh_mu_r, std_r = _reference_forward(
        obs, epsilon, params, ACT_DIM)
    assert jnp.allclose(pi, pi_r, atol=1e-4, rtol=1e-4)
    assert jnp.allclose(tanh_mu, tanh_mu_r, atol=1e-4, rtol=1e-4)
    assert jnp.allclose(std, std_r, atol=1e-4, rtol=1e-4)
    assert jnp.allclose(logp, logp_r, atol=1e-3, rtol=1e-3)

    print("KERNEL_OK")
</pallas_src>

<mosaic_0001>
module attributes {stable_mosaic.version = 11 : i64} {
  func.func @_actor_kernel(%arg0: i32, %arg1: memref<17x8xbf16, #tpu.memory_space<vmem>>, %arg2: memref<4x8xf32, #tpu.memory_space<vmem>>, %arg3: memref<32x17xbf16, #tpu.memory_space<vmem>>, %arg4: memref<32x32xbf16, #tpu.memory_space<vmem>>, %arg5: memref<8x32xbf16, #tpu.memory_space<vmem>>, %arg6: memref<40x1xf32, #tpu.memory_space<vmem>>, %arg7: memref<16x8xf32, #tpu.memory_space<vmem>>) attributes {dimension_semantics = [#tpu.dimension_semantics<parallel>], iteration_bounds = array<i64: 1>, scalar_prefetch = 0 : i64, scratch_operands = 0 : i64, tpu.core_type = #tpu.core_type<tc>, window_params = [{transform_indices = @transform_0, window_bounds = array<i64: 17, 8>}, {transform_indices = @transform_1, window_bounds = array<i64: 4, 8>}, {pipeline_mode = #tpu.pipeline_mode<synchronous>, transform_indices = @transform_2, window_bounds = array<i64: 32, 17>}, {pipeline_mode = #tpu.pipeline_mode<synchronous>, transform_indices = @transform_3, window_bounds = array<i64: 32, 32>}, {pipeline_mode = #tpu.pipeline_mode<synchronous>, transform_indices = @transform_4, window_bounds = array<i64: 8, 32>}, {pipeline_mode = #tpu.pipeline_mode<synchronous>, transform_indices = @transform_5, window_bounds = array<i64: 40, 1>}, {transform_indices = @transform_6, window_bounds = array<i64: 16, 8>}]} {
    %c0 = arith.constant 0 : index
    %c0_0 = arith.constant 0 : index
    %0 = vector.load %arg1[%c0, %c0_0] : memref<17x8xbf16, #tpu.memory_space<vmem>>, vector<17x8xbf16>
    %c0_1 = arith.constant 0 : index
    %c0_2 = arith.constant 0 : index
    %1 = vector.load %arg3[%c0_1, %c0_2] : memref<32x17xbf16, #tpu.memory_space<vmem>>, vector<32x17xbf16>
    %cst = arith.constant dense<0.000000e+00> : vector<32x8xf32>
    %2 = tpu.matmul %1, %0, %cst {dimension_numbers = #tpu.dot_dimension_numbers<[1], [0], [0], [1], [0, 0, 1, 1], [], []>} : vector<32x17xbf16>, vector<17x8xbf16>, vector<32x8xf32> -> vector<32x8xf32>
    %cst_3 = arith.constant 0.000000e+00 : f32
    %3 = vector.broadcast %cst_3 : f32 to vector<32x8xf32>
    %4 = arith.maximumf %2, %3 : vector<32x8xf32>
    %c0_4 = arith.constant 0 : index
    %c0_5 = arith.constant 0 : index
    %5 = vector.load %arg6[%c0_4, %c0_5] : memref<40x1xf32, #tpu.memory_space<vmem>>, vector<32x1xf32>
    %c0_6 = arith.constant 0 : index
    %c0_7 = arith.constant 0 : index
    %6 = vector.load %arg4[%c0_6, %c0_7] : memref<32x32xbf16, #tpu.memory_space<vmem>>, vector<32x32xbf16>
    %7 = arith.truncf %4 : vector<32x8xf32> to vector<32x8xbf16>
    %cst_8 = arith.constant dense<0.000000e+00> : vector<32x8xf32>
    %8 = tpu.matmul %6, %7, %cst_8 {dimension_numbers = #tpu.dot_dimension_numbers<[1], [0], [0], [1], [0, 0, 1, 1], [], []>} : vector<32x32xbf16>, vector<32x8xbf16>, vector<32x8xf32> -> vector<32x8xf32>
    %9 = vector.broadcast %5 : vector<32x1xf32> to vector<32x8xf32>
    %10 = arith.addf %8, %9 : vector<32x8xf32>
    %cst_9 = arith.constant 0.000000e+00 : f32
    %11 = vector.broadcast %cst_9 : f32 to vector<32x8xf32>
    %12 = arith.maximumf %10, %11 : vector<32x8xf32>
    %c32 = arith.constant 32 : index
    %c0_10 = arith.constant 0 : index
    %13 = vector.load %arg6[%c32, %c0_10] : memref<40x1xf32, #tpu.memory_space<vmem>>, vector<8x1xf32>
    %c0_11 = arith.constant 0 : index
    %c0_12 = arith.constant 0 : index
    %14 = vector.load %arg5[%c0_11, %c0_12] : memref<8x32xbf16, #tpu.memory_space<vmem>>, vector<8x32xbf16>
    %15 = arith.truncf %12 : vector<32x8xf32> to vector<32x8xbf16>
    %cst_13 = arith.constant dense<0.000000e+00> : vector<8x8xf32>
    %16 = tpu.matmul %14, %15, %cst_13 {dimension_numbers = #tpu.dot_dimension_numbers<[1], [0], [0], [1], [0, 0, 1, 1], [], []>} : vector<8x32xbf16>, vector<32x8xbf16>, vector<8x8xf32> -> vector<8x8xf32>
    %17 = vector.broadcast %13 : vector<8x1xf32> to vector<8x8xf32>
    %18 = arith.addf %16, %17 : vector<8x8xf32>
    %19 = vector.extract_strided_slice %18 {offsets = [0, 0], sizes = [4, 8], strides = [1, 1]} : vector<8x8xf32> to vector<4x8xf32>
    %20 = vector.extract_strided_slice %18 {offsets = [4, 0], sizes = [4, 8], strides = [1, 1]} : vector<8x8xf32> to vector<4x8xf32>
    %cst_14 = arith.constant -2.000000e+01 : f32
    %cst_15 = arith.constant 2.000000e+00 : f32
    %21 = vector.broadcast %cst_14 : f32 to vector<4x8xf32>
    %22 = arith.maximumf %21, %20 : vector<4x8xf32>
    %23 = vector.broadcast %cst_15 : f32 to vector<4x8xf32>
    %24 = arith.minimumf %23, %22 : vector<4x8xf32>
    %25 = math.exp %24 : vector<4x8xf32>
    %c0_16 = arith.constant 0 : index
    %c0_17 = arith.constant 0 : index
    %26 = vector.load %arg2[%c0_16, %c0_17] : memref<4x8xf32, #tpu.memory_space<vmem>>, vector<4x8xf32>
    %27 = arith.mulf %26, %25 : vector<4x8xf32>
    %28 = arith.addf %19, %27 : vector<4x8xf32>
    %29 = math.tanh %28 : vector<4x8xf32>
    %30 = math.tanh %19 : vector<4x8xf32>
    %cst_18 = arith.constant 9.99999993E-9 : f32
    %31 = vector.broadcast %cst_18 : f32 to vector<4x8xf32>
    %32 = arith.addf %25, %31 : vector<4x8xf32>
    %33 = tpu.reciprocal %32 {approx = true} : vector<4x8xf32> -> vector<4x8xf32>
    %34 = arith.mulf %27, %33 : vector<4x8xf32>
    %cst_19 = arith.constant 5.000000e-01 : f32
    %35 = vector.broadcast %cst_19 : f32 to vector<4x8xf32>
    %36 = arith.mulf %35, %34 : vector<4x8xf32>
    %37 = arith.mulf %36, %34 : vector<4x8xf32>
    %38 = arith.addf %24, %37 : vector<4x8xf32>
    %cst_20 = arith.constant dense<0.000000e+00> : vector<8xf32>
    %39 = vector.multi_reduction <add>, %38, %cst_20 [0] : vector<4x8xf32> to vector<8xf32>
    %40 = vector.shape_cast %39 : vector<8xf32> to vector<1x8xf32>
    %cst_21 = arith.constant 3.67575407 : f32
    %41 = vector.broadcast %cst_21 : f32 to vector<1x8xf32>
    %42 = arith.addf %40, %41 : vector<1x8xf32>
    %cst_22 = arith.constant 0.000000e+00 : f32
    %43 = vector.broadcast %cst_22 : f32 to vector<1x8xf32>
    %44 = arith.subf %43, %42 : vector<1x8xf32>
    %45 = arith.mulf %29, %29 : vector<4x8xf32>
    %cst_23 = arith.constant 1.000000e+00 : f32
    %46 = vector.broadcast %cst_23 : f32 to vector<4x8xf32>
    %47 = arith.subf %46, %45 : vector<4x8xf32>
    %cst_24 = arith.constant 9.99999993E-9 : f32
    %48 = vector.broadcast %cst_24 : f32 to vector<4x8xf32>
    %49 = arith.addf %47, %48 : vector<4x8xf32>
    %50 = math.log %49 : vector<4x8xf32>
    %cst_25 = arith.constant dense<0.000000e+00> : vector<8xf32>
    %51 = vector.multi_reduction <add>, %50, %cst_25 [0] : vector<4x8xf32> to vector<8xf32>
    %52 = vector.shape_cast %51 : vector<8xf32> to vector<1x8xf32>
    %53 = arith.subf %44, %52 : vector<1x8xf32>
    %c0_26 = arith.constant 0 : index
    %c0_27 = arith.constant 0 : index
    %54 = vector.load %arg7[%c0_26, %c0_27] : memref<16x8xf32, #tpu.memory_space<vmem>>, vector<4x8xf32>
    tpu.vector_store %arg7[%c0_26, %c0_27], %29 {strides = array<i32>} : memref<16x8xf32, #tpu.memory_space<vmem>>, vector<4x8xf32>,
    %c4 = arith.constant 4 : index
    %c0_28 = arith.constant 0 : index
    %55 = vector.load %arg7[%c4, %c0_28] : memref<16x8xf32, #tpu.memory_space<vmem>>, vector<4x8xf32>
    tpu.vector_store %arg7[%c4, %c0_28], %30 {strides = array<i32>} : memref<16x8xf32, #tpu.memory_space<vmem>>, vector<4x8xf32>,
    %c8 = arith.constant 8 : index
    %c0_29 = arith.constant 0 : index
    %56 = vector.load %arg7[%c8, %c0_29] : memref<16x8xf32, #tpu.memory_space<vmem>>, vector<4x8xf32>
    tpu.vector_store %arg7[%c8, %c0_29], %25 {strides = array<i32>} : memref<16x8xf32, #tpu.memory_space<vmem>>, vector<4x8xf32>,
    %c12 = arith.constant 12 : index
    %c0_30 = arith.constant 0 : index
    %57 = vector.load %arg7[%c12, %c0_30] : memref<16x8xf32, #tpu.memory_space<vmem>>, vector<1x8xf32>
    tpu.vector_store %arg7[%c12, %c0_30], %53 {strides = array<i32>} : memref<16x8xf32, #tpu.memory_space<vmem>>, vector<1x8xf32>,
    %cst_31 = arith.constant 0.000000e+00 : f32
    %58 = vector.broadcast %cst_31 : f32 to vector<3x8xf32>
    %c13 = arith.constant 13 : index
    %c0_32 = arith.constant 0 : index
    %59 = vector.load %arg7[%c13, %c0_32] : memref<16x8xf32, #tpu.memory_space<vmem>>, vector<3x8xf32>
    tpu.vector_store %arg7[%c13, %c0_32], %58 {strides = array<i32>} : memref<16x8xf32, #tpu.memory_space<vmem>>, vector<3x8xf32>,
    return
  }
  func.func @transform_0(%arg0: i32) -> (i32, i32) {
    %c0_i32 = arith.constant 0 : i32
    %c0_i32_0 = arith.constant 0 : i32
    return %c0_i32, %arg0 : i32, i32
  }
  func.func @transform_1(%arg0: i32) -> (i32, i32) {
    %c0_i32 = arith.constant 0 : i32
    %c0_i32_0 = arith.constant 0 : i32
    return %c0_i32, %arg0 : i32, i32
  }
  func.func @transform_2(%arg0: i32) -> (i32, i32) {
    %c0_i32 = arith.constant 0 : i32
    %c0_i32_0 = arith.constant 0 : i32
    %c0_i32_1 = arith.constant 0 : i32
    return %c0_i32, %c0_i32_0 : i32, i32
  }
  func.func @transform_3(%arg0: i32) -> (i32, i32) {
    %c0_i32 = arith.constant 0 : i32
    %c0_i32_0 = arith.constant 0 : i32
    %c0_i32_1 = arith.constant 0 : i32
    return %c0_i32, %c0_i32_0 : i32, i32
  }
  func.func @transform_4(%arg0: i32) -> (i32, i32) {
    %c0_i32 = arith.constant 0 : i32
    %c0_i32_0 = arith.constant 0 : i32
    %c0_i32_1 = arith.constant 0 : i32
    return %c0_i32, %c0_i32_0 : i32, i32
  }
  func.func @transform_5(%arg0: i32) -> (i32, i32) {
    %c0_i32 = arith.constant 0 : i32
    %c0_i32_0 = arith.constant 0 : i32
    %c0_i32_1 = arith.constant 0 : i32
    return %c0_i32, %c0_i32_0 : i32, i32
  }
  func.func @transform_6(%arg0: i32) -> (i32, i32) {
    %c0_i32 = arith.constant 0 : i32
    %c0_i32_0 = arith.constant 0 : i32
    return %c0_i32, %arg0 : i32, i32
  }
}

</mosaic_0001>

<bundles_post_ra>
// kernel: tpu_custom_call.1
= control target key start
LH: loop header
LB: loop body
LE: loop exit
PB: predicated region body
PF: predicated region fallthrough
CT: control target
= control target key end

     0   :  { %vm57_vm0 = vcmask 1040384   ;;  %v397_v1 = vmov 0   ;;  %vm50_vm1 = vcmask 138240   ;;  %vm156_vm2 = vcmask 261120   ;;  %s496_s0 = inlined_call_operand.vmem [shape: bf16[17,8], index: 0, kind: input, shape index: {}]   ;;  %s497_s2 = inlined_call_operand.vmem [shape: bf16[32,17], index: 2, kind: input, shape index: {}]   ;;  %s498_s3 = inlined_call_operand.vmem [shape: bf16[32,32], index: 3, kind: input, shape index: {}]   ;;  %s499_s5 = inlined_call_operand.vmem [shape: f32[40,1], index: 5, kind: input, shape index: {}]   ;;  %s500_s6 = inlined_call_operand.vmem [shape: f32[16,8], index: 6, kind: output, shape index: {}]   ;;  %s501_s4 = inlined_call_operand.vmem [shape: bf16[8,32], index: 4, kind: input, shape index: {}]   ;;  %s502_s1 = inlined_call_operand.vmem [shape: f32[4,8], index: 1, kind: input, shape index: {}]  }
   0x1   :  { %v381_v0 = vld [vmem:[%s496_s0 + $0x8] ss:$0 sps:$4 sm:$0x11]   ;;  %v59_v2 = vsel %vm57_vm0, 65535, %v397_v1  ;;  %379 = vset.pattern.permute.xlu0 %v397_v1  ;;  %380 = vset.pattern.permute.xlu1 %v397_v1  ;;  %v382_v3 = vld [vmem:[%s496_s0] sm:$0xff]   ;;  %v118_v8 = vld [vmem:[%s499_s5 + $0x10] sm:$0xff] }
   0x2   :  { %v61_v4 = vand.u32 %v381_v0, %v59_v2  ;;  %v383_v5 = vld [vmem:[%s497_s2] sm:$0xff]   ;;  %v384_v6 = vld [vmem:[%s497_s2 + $0x8] sm:$0xff]   ;;  %138 = vperm.xlu0 %379, %v118_v8   ;;  %v119_v10 = vld [vmem:[%s499_s5 + $0x18] sm:$0xff]  ;;  %v398_v24 = vmov 0.0   ;;  %vm324_vm3 = vcmask 59392   ;;  %vm399_vm4 = vmmov 0  }
   0x3   :  { %356 = vmatprep.mubr.msk.bf16.mxu0 %vm50_vm1, %v383_v5  ;;  %v385_v7 = vld [vmem:[%s498_s3] sm:$0xff]   ;;  %v117_v11 = vld [vmem:[%s499_s5 + $0x8] sm:$0xff]  ;;  %325 = vst.msk [vmem:[%s500_s6 + $0xd] sm:$0x7] %vm324_vm3, %v398_v24  ;;  %vm295_vm5 = vcmask 60416   ;;  %vm320_vm6 = vcmask 64516  }
   0x4   :  { %352 = vmatprep.subr.bf16.mxu0 %v61_v4  ;;  %364 = vmatprep.mubr.msk.bf16.mxu1 %vm156_vm2, %v385_v7  ;;  %v116_v9 = vld [vmem:[%s499_s5] sm:$0xff]  ;;  %v386_v23 = vld [vmem:[%s498_s3 + $0x8] sm:$0xff]   ;;  %vm322_vm7 = vcmask 57344  }
   0x5   :  { %353 = vmatpush3.bf16.msra.mxu0 %v61_v4  ;;  %128 = vperm.xlu1 %380, %v116_v9   ;;  %v216_v12 = vld [vmem:[%s499_s5 + $0x20] sm:$0xff] }
   0x6   :  { %354 = vmatprep.subr.bf16.mxu0 %v382_v3  ;;  %143 = vperm.xlu0 %379, %v119_v10   ;;  %v217_v43 = vld [vmem:[%s501_s4] sm:$0xf] }
   0x7   :  { %v272_v55 = vld [vmem:[%s502_s1] sm:$0xf] }
   0x9   :  { %355 = vmatpush3.bf16.msra.mxu0 %v382_v3  ;;  %133 = vperm.xlu1 %380, %v117_v11  }
   0xa   :  { %222 = vperm.xlu0 %379, %v216_v12   ;;  %368 = vmatprep.subr.bf16.mxu0 %v398_v24 }
   0xc   :  { %357 = vmatmul.mubr.msk.bf16.vlgmr.msra.gmra.mxu0 %vm50_vm1, %v384_v6 }
   0xd   :  { %372 = vmatprep.mubr.msk.bf16.mxu0 %vm399_vm4, %v398_v24 }
  0x7d   :  { %v139_v25 = vpop.permute.xlu0 %138 }
  0x80   :  { %v129_v26 = vpop.permute.xlu1 %128 }
  0x81   :  { %v144_v30 = vpop.permute.xlu0 %143 }
  0x84   :  { %v134_v33 = vpop.permute.xlu1 %133 }
  0x85   :  { %v223_v44 = vpop.permute.xlu0 %222 }
  0xcc   :  { %v358_v13 = vpop.f32.mrf.mxu0 }
  0xcd   :  { %v114_v16 = vmax.f32 %v358_v13, 0.0 }
  0xce   :  { %v97_v14 = vpop.f32.mrf.mxu0 }
  0xcf   :  { %v112_v19 = vmax.f32 %v97_v14, 0.0 }
  0xd0   :  { %v359_v15 = vpop.f32.mrf.mxu0 }
  0xd1   :  { %v115_v17 = vmax.f32 %v359_v15, 0.0 }
  0xd2   :  { %v100_v18 = vpop.f32.mrf.mxu0 }
  0xd3   :  { %v113_v20 = vmax.f32 %v100_v18, 0.0  ;;  %v125_v21 = vpack.c.bf16 %v115_v17, %v114_v16 }
  0xd5   :  { %v124_v22 = vpack.c.bf16 %v113_v20, %v112_v19  ;;  %360 = vmatprep.subr.bf16.mxu1 %v125_v21 }
  0xd6   :  { %361 = vmatpush3.bf16.msra.mxu1 %v125_v21 }
  0xd7   :  { %362 = vmatprep.subr.bf16.mxu1 %v124_v22 }
  0xda   :  { %363 = vmatpush3.bf16.msra.mxu1 %v124_v22 }
  0xdd   :  { %365 = vmatmul.mubr.msk.bf16.vlgmr.msra.gmra.mxu1 %vm156_vm2, %v386_v23 }
 0x19d   :  { %v366_v27 = vpop.f32.mrf.mxu1 }
 0x19e   :  { %v206_v29 = vadd.f32 %v366_v27, %v139_v25 }
 0x19f   :  { %v197_v28 = vpop.f32.mrf.mxu1 }
 0x1a0   :  { %v214_v35 = vmax.f32 %v206_v29, 0.0  ;;  %v198_v36 = vadd.f32 %v197_v28, %v129_v26 }
 0x1a1   :  { %v367_v31 = vpop.f32.mrf.mxu1 }
 0x1a2   :  { %v209_v32 = vadd.f32 %v367_v31, %v144_v30  ;;  %v212_v41 = vmax.f32 %v198_v36, 0.0 }
 0x1a3   :  { %v200_v34 = vpop.f32.mrf.mxu1 }
 0x1a4   :  { %v215_v37 = vmax.f32 %v209_v32, 0.0  ;;  %v201_v38 = vadd.f32 %v200_v34, %v134_v33 }
 0x1a6   :  { %v219_v39 = vpack.c.bf16 %v215_v37, %v214_v35  ;;  %v213_v40 = vmax.f32 %v201_v38, 0.0 }
 0x1a8   :  { %369 = vmatpush3.bf16.msra.mxu0 %v219_v39  ;;  %v218_v42 = vpack.c.bf16 %v213_v40, %v212_v41 }
 0x1a9   :  { %370 = vmatprep.subr.bf16.mxu0 %v398_v24 }
 0x1ac   :  { %371 = vmatpush3.bf16.msra.mxu0 %v218_v42 }
 0x1af   :  { %373 = vmatmul.mubr.msk.bf16.vlgmr.msra.gmra.mxu0 %vm156_vm2, %v217_v43 }
 0x26f   :  { %v262_v45 = vpop.f32.mrf.mxu0 }
 0x270   :  { %v263_v46 = vadd.f32 %v262_v45, %v223_v44 }
 0x271   :  { %v374_v47 = vpop.f32.mrf.mxu0 }
 0x272   :  { %v268_v48 = vmax.f32 %v263_v46, -20.0  ;;  %387 = vtanh.f32 %v263_v46 }
 0x273   :  { %v265_v49 = vpop.f32.mrf.mxu0 }
 0x274   :  { %v269_v50 = vmin.f32 %v268_v48, 2.0 }
 0x275   :  { %v375_v51 = vpop.f32.mrf.mxu0 }
 0x276   :  { %v270_v52 = vmul.f32 1.442695, %v269_v50 }
 0x278   :  { %389 = vpow2.f32 %v270_v52 }
 0x27f   :  { %v388_v53 = vpop.eup %387 }
 0x280   :  { %319 = vst.msk [vmem:[%s500_s6 + $0x4] sm:$0xf] %vm295_vm5, %v388_v53 }
 0x285   :  { %v390_v54 = vpop.eup %389 }
 0x286   :  { %v274_v56 = vrot.slane %v390_v54, 4  ;;  %v280_v57 = vadd.f32 1e-08, %v390_v54  ;;  %321 = vst.msk [vmem:[%s500_s6 + $0x4] sm:$0xf0] %vm320_vm6, %v390_v54 }
 0x288   :  { %v276_v58 = vmul.f32 %v274_v56, %v272_v55  ;;  %391 = vrcp.f32 %v280_v57 }
 0x28a   :  { %v277_v59 = vadd.f32 %v276_v58, %v263_v46 }
 0x28c   :  { %393 = vtanh.f32 %v277_v59 }
 0x295   :  { %v392_v60 = vpop.eup %391 }
 0x296   :  { %v283_v61 = vrot.slane %v392_v60, 4 }
 0x298   :  { %v285_v62 = vmul.f32 %v283_v61, %v276_v58 }
 0x299   :  { %v394_v63 = vpop.eup %393 }
 0x29a   :  { %v286_v0 = vmul.f32 0.5, %v285_v62  ;;  %v305_v1 = vmul.f32 %v394_v63, %v394_v63  ;;  %318 = vst.msk [vmem:[%s500_s6] sm:$0xf] %vm295_vm5, %v394_v63 }
 0x29c   :  { %v287_v2 = vmul.f32 %v286_v0, %v285_v62  ;;  %v306_v3 = vsub.f32 1.0, %v305_v1 }
 0x29e   :  { %v289_v4 = vrot.slane %v287_v2, 4  ;;  %v307_v5 = vadd.f32 1e-08, %v306_v3 }
 0x2a0   :  { %v291_v6 = vadd.f32 %v289_v4, %v269_v50  ;;  %395 = vlog2.f32 %v307_v5 }
 0x2a2   :  { %v293_v7 = vrot.slane %v291_v6, 4 }
 0x2a4   :  { %v296_v8 = vsel %vm295_vm5, %v293_v7, 0.0 }
 0x2a5   :  { %v297_v9 = vrot.slane %v296_v8, 4 }
 0x2a7   :  { %v298_v10 = vadd.f32 %v297_v9, %v296_v8 }
 0x2a9   :  { %v299_v11 = vrot.slane %v298_v10, 2 }
 0x2ab   :  { %v300_v12 = vadd.f32 %v299_v11, %v298_v10 }
 0x2ad   :  { %v396_v13 = vpop.eup %395  ;;  %v301_v15 = vrot.slane %v300_v12, 1 }
 0x2ae   :  { %v309_v14 = vmul.f32 0.6931472, %v396_v13 }
 0x2af   :  { %v302_v18 = vadd.f32 %v301_v15, %v300_v12 }
 0x2b0   :  { %v310_v16 = vsel %vm295_vm5, %v309_v14, 0.0 }
 0x2b1   :  { %v311_v17 = vrot.slane %v310_v16, 4  ;;  %v303_v21 = vadd.f32 3.675754, %v302_v18 }
 0x2b3   :  { %v312_v19 = vadd.f32 %v311_v17, %v310_v16  ;;  %v304_v24 = vsub.f32 0.0, %v303_v21 }
 0x2b5   :  { %v313_v20 = vrot.slane %v312_v19, 2 }
 0x2b7   :  { %v314_v22 = vadd.f32 %v313_v20, %v312_v19 }
 0x2b9   :  { %v315_v23 = vrot.slane %v314_v22, 1 }
 0x2bb   :  { %v316_v25 = vadd.f32 %v315_v23, %v314_v22 }
 0x2bd   :  { %v317_v26 = vsub.f32 %v304_v24, %v316_v25 }
 0x2bf   :  { %323 = vst.msk [vmem:[%s500_s6 + $0xc] sm:$0x1] %vm322_vm7, %v317_v26 }

</bundles_post_ra>
